<compile_context>
chip_gen: v6e
topology: v6e:2x2x1
jax: 0.10.0
libtpu: 0.0.40
codegen_flags: <defaults>
</compile_context>

<pallas_src>
import functools

import jax
import jax.numpy as jnp
from jax.experimental import pallas as pl
from jax.experimental.pallas import tpu as pltpu


def _round_up(x: int, m: int) -> int:
    return ((x + m - 1) // m) * m


def _pick_tile(dim: int, max_tile: int = 512) -> int:
    """Smallest multiple of 128 covering `dim`, capped at `max_tile`."""
    padded = _round_up(dim, 128)
    return padded if padded <= max_tile else max_tile


def _adaptive_lp_kernel(v1_ref, v2_ref, o_ref, acc_ref):
    """One (tm, tn) output tile; K-axis reduction held in a VMEM accumulator."""
    k = pl.program_id(2)

    @pl.when(k == 0)
    def _init():
        acc_ref[...] = jnp.zeros_like(acc_ref)

    # MXU matmul with f32 accumulation.
    acc_ref[...] += jnp.dot(
        v1_ref[...], v2_ref[...], preferred_element_type=jnp.float32
    )

    @pl.when(k == pl.num_programs(2) - 1)
    def _finalize():
        # Sigmoid maps to the EUP slot (free alongside MXU/VPU work).
        o_ref[...] = jax.nn.sigmoid(acc_ref[...]).astype(o_ref.dtype)


@functools.partial(jax.jit, static_argnames=("out_dtype",))
def adaptive_lp(nodevec1: jax.Array, nodevec2: jax.Array, *, out_dtype=None) -> jax.Array:
    """sigmoid(nodevec1 @ nodevec2) as a tiled, pipelined Pallas TPU kernel."""
    M, K = nodevec1.shape
    K2, N = nodevec2.shape
    assert K == K2, "contraction dims must match"
    out_dtype = out_dtype or nodevec1.dtype

    # Tile sizes: lane-dense (multiples of 128), capped so the double-buffered
    # working set 2*(tm*tk + tk*tn)*4 + tm*tn*4 stays well under scoped VMEM
    # on all of v5e / v6e / v7x.
    tm = _pick_tile(M)
    tn = _pick_tile(N)
    tk = _pick_tile(K)

    Mp, Np, Kp = _round_up(M, tm), _round_up(N, tn), _round_up(K, tk)

    # Zero-pad to tile multiples (padding contributes 0 to the matmul; padded
    # output rows/cols are dropped below).
    v1 = nodevec1
    v2 = nodevec2
    if (Mp, Kp) != (M, K):
        v1 = jnp.pad(v1, ((0, Mp - M), (0, Kp - K)))
    if (Kp, Np) != (K, N):
        v2 = jnp.pad(v2, ((0, Kp - K), (0, Np - N)))

    grid = (Mp // tm, Np // tn, Kp // tk)

    out_padded = pl.pallas_call(
        _adaptive_lp_kernel,
        out_shape=jax.ShapeDtypeStruct((Mp, Np), out_dtype),
        grid=grid,
        in_specs=[
            pl.BlockSpec((tm, tk), lambda i, j, k: (i, k)),
            pl.BlockSpec((tk, tn), lambda i, j, k: (k, j)),
        ],
        out_specs=pl.BlockSpec((tm, tn), lambda i, j, k: (i, j)),
        scratch_shapes=[pltpu.VMEM((tm, tn), jnp.float32)],
        compiler_params=pltpu.CompilerParams(
            dimension_semantics=("parallel", "parallel", "arbitrary")
        ),
    )(v1, v2)

    if (Mp, Np) != (M, N):
        out_padded = out_padded[:M, :N]
    return out_padded


if __name__ == "__main__":
    # Module hyper-params (small, consistent with the forward semantics).
    # NOTE: at this size a standalone kernel is launch/DMA-overhead dominated;
    # the tiled/padded structure above is what earns its keep when num_feats
    # grows, while still running correctly (and lane-dense) at 16x32.
    num_feats = 16
    num_hidden = 32

    # Deterministic "torch.randn"-style parameter init.
    key = jax.random.PRNGKey(0)
    k1, k2 = jax.random.split(key)
    nodevec1 = jax.random.normal(k1, (num_feats, num_hidden), dtype=jnp.float32)
    nodevec2 = jax.random.normal(k2, (num_hidden, num_feats), dtype=jnp.float32)

    out = adaptive_lp(nodevec1, nodevec2)
    jax.block_until_ready(out)

    # Correctness check against pure-JAX reference (f32 path -> tight tol).
    ref = jax.nn.sigmoid(nodevec1 @ nodevec2)
    assert out.shape == (num_feats, num_feats)
    assert jnp.allclose(out, ref, atol=1e-5, rtol=1e-5)

    print("KERNEL_OK")
</pallas_src>

<mosaic_0001>
module attributes {stable_mosaic.version = 11 : i64} {
  func.func @_adaptive_lp_kernel(%arg0: i32, %arg1: i32, %arg2: i32, %arg3: memref<128x128xf32, #tpu.memory_space<vmem>>, %arg4: memref<128x128xf32, #tpu.memory_space<vmem>>, %arg5: memref<128x128xf32, #tpu.memory_space<vmem>>, %arg6: memref<128x128xf32, #tpu.memory_space<vmem>>) attributes {dimension_semantics = [#tpu.dimension_semantics<parallel>, #tpu.dimension_semantics<parallel>, #tpu.dimension_semantics<arbitrary>], iteration_bounds = array<i64: 1, 1, 1>, scalar_prefetch = 0 : i64, scratch_operands = 1 : i64, tpu.core_type = #tpu.core_type<tc>, window_params = [{transform_indices = @transform_0, window_bounds = array<i64: 128, 128>}, {transform_indices = @transform_1, window_bounds = array<i64: 128, 128>}, {transform_indices = @transform_2, window_bounds = array<i64: 128, 128>}]} {
    %c0_i32 = arith.constant 0 : i32
    %0 = arith.cmpi eq, %arg2, %c0_i32 : i32
    %1 = arith.extui %0 : i1 to i32
    %c0_i32_0 = arith.constant 0 : i32
    %2 = arith.cmpi ne, %1, %c0_i32_0 : i32
    scf.if %2 {
      %cst_10 = arith.constant 0.000000e+00 : f32
      %12 = vector.broadcast %cst_10 : f32 to vector<128x128xf32>
      %c0_11 = arith.constant 0 : index
      %c0_12 = arith.constant 0 : index
      %13 = vector.load %arg6[%c0_11, %c0_12] : memref<128x128xf32, #tpu.memory_space<vmem>>, vector<128x128xf32>
      tpu.vector_store %arg6[%c0_11, %c0_12], %12 {strides = array<i32>} : memref<128x128xf32, #tpu.memory_space<vmem>>, vector<128x128xf32>,
    } else {
    }
    %c0 = arith.constant 0 : index
    %c0_1 = arith.constant 0 : index
    %3 = vector.load %arg6[%c0, %c0_1] : memref<128x128xf32, #tpu.memory_space<vmem>>, vector<128x128xf32>
    %c0_2 = arith.constant 0 : index
    %c0_3 = arith.constant 0 : index
    %4 = vector.load %arg3[%c0_2, %c0_3] : memref<128x128xf32, #tpu.memory_space<vmem>>, vector<128x128xf32>
    %c0_4 = arith.constant 0 : index
    %c0_5 = arith.constant 0 : index
    %5 = vector.load %arg4[%c0_4, %c0_5] : memref<128x128xf32, #tpu.memory_space<vmem>>, vector<128x128xf32>
    %cst = arith.constant dense<0.000000e+00> : vector<128x128xf32>
    %6 = tpu.matmul %4, %5, %cst {dimension_numbers = #tpu.dot_dimension_numbers<[1], [0], [0], [1], [0, 0, 1, 1], [], []>} : vector<128x128xf32>, vector<128x128xf32>, vector<128x128xf32> -> vector<128x128xf32>
    %7 = arith.addf %3, %6 : vector<128x128xf32>
    %c0_6 = arith.constant 0 : index
    %c0_7 = arith.constant 0 : index
    %8 = vector.load %arg6[%c0_6, %c0_7] : memref<128x128xf32, #tpu.memory_space<vmem>>, vector<128x128xf32>
    tpu.vector_store %arg6[%c0_6, %c0_7], %7 {strides = array<i32>} : memref<128x128xf32, #tpu.memory_space<vmem>>, vector<128x128xf32>,
    %c0_i32_8 = arith.constant 0 : i32
    %9 = arith.cmpi eq, %arg2, %c0_i32_8 : i32
    %10 = arith.extui %9 : i1 to i32
    %c0_i32_9 = arith.constant 0 : i32
    %11 = arith.cmpi ne, %10, %c0_i32_9 : i32
    scf.if %11 {
      %c0_10 = arith.constant 0 : index
      %c0_11 = arith.constant 0 : index
      %12 = vector.load %arg6[%c0_10, %c0_11] : memref<128x128xf32, #tpu.memory_space<vmem>>, vector<128x128xf32>
      %13 = arith.negf %12 : vector<128x128xf32>
      %14 = math.exp %13 : vector<128x128xf32>
      %cst_12 = arith.constant 1.000000e+00 : f32
      %15 = vector.broadcast %cst_12 : f32 to vector<128x128xf32>
      %16 = arith.addf %15, %14 : vector<128x128xf32>
      %17 = arith.divf %15, %16 : vector<128x128xf32>
      %c0_13 = arith.constant 0 : index
      %c0_14 = arith.constant 0 : index
      %18 = vector.load %arg5[%c0_13, %c0_14] : memref<128x128xf32, #tpu.memory_space<vmem>>, vector<128x128xf32>
      tpu.vector_store %arg5[%c0_13, %c0_14], %17 {strides = array<i32>} : memref<128x128xf32, #tpu.memory_space<vmem>>, vector<128x128xf32>,
    } else {
    }
    return
  }
  func.func @transform_0(%arg0: i32, %arg1: i32, %arg2: i32) -> (i32, i32) {
    %c0_i32 = arith.constant 0 : i32
    return %arg0, %arg2 : i32, i32
  }
  func.func @transform_1(%arg0: i32, %arg1: i32, %arg2: i32) -> (i32, i32) {
    %c0_i32 = arith.constant 0 : i32
    return %arg2, %arg1 : i32, i32
  }
  func.func @transform_2(%arg0: i32, %arg1: i32, %arg2: i32) -> (i32, i32) {
    %c0_i32 = arith.constant 0 : i32
    return %arg0, %arg1 : i32, i32
  }
}

</mosaic_0001>

<bundles_post_ra>
// kernel: adaptive_lp.1
= control target key start
LH: loop header
LB: loop body
LE: loop exit
PB: predicated region body
PF: predicated region fallthrough
CT: control target
= control target key end

     0   :  { %s750_s1 = inlined_call_operand.vmem [shape: f32[128,128], index: 1, kind: input, shape index: {}]   ;;  %s751_s0 = inlined_call_operand.vmem [shape: f32[128,128], index: 0, kind: input, shape index: {}]   ;;  %s752_s2 = inlined_call_operand.vmem [shape: f32[128,128], index: 2, kind: output, shape index: {}]  }
   0x1   :  { %v78_v0 = vld [vmem:[%s750_s1 + $0x78] sm:$0xff]  ;;  %v77_v1 = vld [vmem:[%s750_s1 + $0x70] sm:$0xff]  ;;  %v76_v2 = vld [vmem:[%s750_s1 + $0x68] sm:$0xff] }
   0x2   :  { %439 = vmatprep.subr.mxu0 %v78_v0  ;;  %495 = vmatprep.subr.mxu1 %v78_v0  ;;  %v75_v3 = vld [vmem:[%s750_s1 + $0x60] sm:$0xff]  ;;  %v74_v4 = vld [vmem:[%s750_s1 + $0x58] sm:$0xff]  ;;  %v73_v5 = vld [vmem:[%s750_s1 + $0x50] sm:$0xff] }
   0x3   :  { %440 = vmatpush3.msra.mxu0 %v78_v0  ;;  %511 = vmatpush3.msra.mxu1 %v78_v0  ;;  %v72_v6 = vld [vmem:[%s750_s1 + $0x48] sm:$0xff]  ;;  %v71_v7 = vld [vmem:[%s750_s1 + $0x40] sm:$0xff]  ;;  %v70_v8 = vld [vmem:[%s750_s1 + $0x38] sm:$0xff] }
   0x4   :  { %441 = vmatprep.subr.mxu0 %v77_v1  ;;  %496 = vmatprep.subr.mxu1 %v77_v1  ;;  %v69_v9 = vld [vmem:[%s750_s1 + $0x30] sm:$0xff]  ;;  %v68_v10 = vld [vmem:[%s750_s1 + $0x28] sm:$0xff]  ;;  %v67_v11 = vld [vmem:[%s750_s1 + $0x20] sm:$0xff] }
   0x5   :  { %442 = vmatpush3.msra.mxu0 %v77_v1  ;;  %512 = vmatpush3.msra.mxu1 %v77_v1  ;;  %v66_v12 = vld [vmem:[%s750_s1 + $0x18] sm:$0xff]  ;;  %v65_v13 = vld [vmem:[%s750_s1 + $0x10] sm:$0xff]  ;;  %v64_v14 = vld [vmem:[%s750_s1 + $0x8] sm:$0xff] }
   0x6   :  { %443 = vmatprep.subr.mxu0 %v76_v2  ;;  %497 = vmatprep.subr.mxu1 %v76_v2  ;;  %v63_v15 = vld [vmem:[%s750_s1] sm:$0xff]  ;;  %v48_v18 = vld [vmem:[%s751_s0 + $0x8] sm:$0xff]  ;;  %v49_v20 = vld [vmem:[%s751_s0 + $0x10] sm:$0xff] }
   0x7   :  { %444 = vmatpush3.msra.mxu0 %v76_v2  ;;  %513 = vmatpush3.msra.mxu1 %v76_v2  ;;  %v47_v16 = vld [vmem:[%s751_s0] sm:$0xff]  ;;  %v56_v19 = vld [vmem:[%s751_s0 + $0x48] sm:$0xff]  ;;  %v57_v21 = vld [vmem:[%s751_s0 + $0x50] sm:$0xff] }
   0x8   :  { %445 = vmatprep.subr.mxu0 %v75_v3  ;;  %498 = vmatprep.subr.mxu1 %v75_v3  ;;  %v55_v17 = vld [vmem:[%s751_s0 + $0x40] sm:$0xff]  ;;  %v50_v22 = vld [vmem:[%s751_s0 + $0x18] sm:$0xff]  ;;  %v52_v26 = vld [vmem:[%s751_s0 + $0x28] sm:$0xff] }
   0x9   :  { %446 = vmatpush3.msra.mxu0 %v75_v3  ;;  %514 = vmatpush3.msra.mxu1 %v75_v3  ;;  %v58_v23 = vld [vmem:[%s751_s0 + $0x58] sm:$0xff]  ;;  %v51_v24 = vld [vmem:[%s751_s0 + $0x20] sm:$0xff]  ;;  %v60_v27 = vld [vmem:[%s751_s0 + $0x68] sm:$0xff] }
   0xa   :  { %447 = vmatprep.subr.mxu0 %v74_v4  ;;  %499 = vmatprep.subr.mxu1 %v74_v4  ;;  %v59_v25 = vld [vmem:[%s751_s0 + $0x60] sm:$0xff]  ;;  %v53_v28 = vld [vmem:[%s751_s0 + $0x30] sm:$0xff]  ;;  %v54_v30 = vld [vmem:[%s751_s0 + $0x38] sm:$0xff] }
   0xb   :  { %448 = vmatpush3.msra.mxu0 %v74_v4  ;;  %515 = vmatpush3.msra.mxu1 %v74_v4  ;;  %v61_v29 = vld [vmem:[%s751_s0 + $0x70] sm:$0xff]  ;;  %v62_v31 = vld [vmem:[%s751_s0 + $0x78] sm:$0xff] }
   0xc   :  { %449 = vmatprep.subr.mxu0 %v73_v5  ;;  %500 = vmatprep.subr.mxu1 %v73_v5 }
   0xd   :  { %450 = vmatpush3.msra.mxu0 %v73_v5  ;;  %516 = vmatpush3.msra.mxu1 %v73_v5 }
   0xe   :  { %451 = vmatprep.subr.mxu0 %v72_v6  ;;  %501 = vmatprep.subr.mxu1 %v72_v6 }
   0xf   :  { %452 = vmatpush3.msra.mxu0 %v72_v6  ;;  %517 = vmatpush3.msra.mxu1 %v72_v6 }
  0x10   :  { %453 = vmatprep.subr.mxu0 %v71_v7  ;;  %502 = vmatprep.subr.mxu1 %v71_v7 }
  0x11   :  { %454 = vmatpush3.msra.mxu0 %v71_v7  ;;  %518 = vmatpush3.msra.mxu1 %v71_v7 }
  0x12   :  { %455 = vmatprep.subr.mxu0 %v70_v8  ;;  %503 = vmatprep.subr.mxu1 %v70_v8 }
  0x13   :  { %456 = vmatpush3.msra.mxu0 %v70_v8  ;;  %519 = vmatpush3.msra.mxu1 %v70_v8 }
  0x14   :  { %457 = vmatprep.subr.mxu0 %v69_v9  ;;  %504 = vmatprep.subr.mxu1 %v69_v9 }
  0x15   :  { %458 = vmatpush3.msra.mxu0 %v69_v9  ;;  %520 = vmatpush3.msra.mxu1 %v69_v9 }
  0x16   :  { %459 = vmatprep.subr.mxu0 %v68_v10  ;;  %505 = vmatprep.subr.mxu1 %v68_v10 }
  0x17   :  { %460 = vmatpush3.msra.mxu0 %v68_v10  ;;  %521 = vmatpush3.msra.mxu1 %v68_v10 }
  0x18   :  { %461 = vmatprep.subr.mxu0 %v67_v11  ;;  %506 = vmatprep.subr.mxu1 %v67_v11 }
  0x19   :  { %462 = vmatpush3.msra.mxu0 %v67_v11  ;;  %522 = vmatpush3.msra.mxu1 %v67_v11 }
  0x1a   :  { %463 = vmatprep.subr.mxu0 %v66_v12  ;;  %507 = vmatprep.subr.mxu1 %v66_v12 }
  0x1b   :  { %464 = vmatpush3.msra.mxu0 %v66_v12  ;;  %523 = vmatpush3.msra.mxu1 %v66_v12 }
  0x1c   :  { %465 = vmatprep.subr.mxu0 %v65_v13  ;;  %508 = vmatprep.subr.mxu1 %v65_v13 }
  0x1d   :  { %466 = vmatpush3.msra.mxu0 %v65_v13  ;;  %524 = vmatpush3.msra.mxu1 %v65_v13 }
  0x1e   :  { %467 = vmatprep.subr.mxu0 %v64_v14  ;;  %509 = vmatprep.subr.mxu1 %v64_v14 }
  0x1f   :  { %468 = vmatpush3.msra.mxu0 %v64_v14  ;;  %525 = vmatpush3.msra.mxu1 %v64_v14 }
  0x20   :  { %469 = vmatprep.subr.mxu0 %v63_v15  ;;  %510 = vmatprep.subr.mxu1 %v63_v15 }
  0x21   :  { %470 = vmatpush3.msra.mxu0 %v63_v15  ;;  %526 = vmatpush3.msra.mxu1 %v63_v15 }
  0x22   :  { %471 = vmatprep.mubr.f32.mxu0 %v47_v16  ;;  %483 = vmatprep.mubr.f32.mxu1 %v55_v17 }
  0x23   :  { %472 = vmatmul.mubr.f32.vlgmr.msra.gmra.mxu0 %v48_v18  ;;  %484 = vmatmul.mubr.f32.vlgmr.msra.gmra.mxu1 %v56_v19 }
  0x24   :  { %474 = vmatprep.mubr.f32.mxu0 %v49_v20  ;;  %486 = vmatprep.mubr.f32.mxu1 %v57_v21 }
  0x27   :  { %475 = vmatmul.mubr.f32.gmra.mxu0 %v50_v22  ;;  %487 = vmatmul.mubr.f32.gmra.mxu1 %v58_v23 }
  0x28   :  { %477 = vmatprep.mubr.f32.mxu0 %v51_v24  ;;  %489 = vmatprep.mubr.f32.mxu1 %v59_v25 }
  0x2b   :  { %478 = vmatmul.mubr.f32.gmra.mxu0 %v52_v26  ;;  %490 = vmatmul.mubr.f32.gmra.mxu1 %v60_v27 }
  0x2c   :  { %480 = vmatprep.mubr.f32.mxu0 %v53_v28  ;;  %492 = vmatprep.mubr.f32.mxu1 %v61_v29 }
  0x2f   :  { %481 = vmatmul.mubr.f32.gmra.mxu0 %v54_v30  ;;  %493 = vmatmul.mubr.f32.gmra.mxu1 %v62_v31 }
  0xe3   :  { %v473_v32 = vpop.f32.mrf.mxu0  ;;  %v485_v33 = vpop.f32.mrf.mxu1 }
  0xe4   :  { %v392_v34 = vmul.f32 -1.442695, %v473_v32  ;;  %v400_v35 = vmul.f32 -1.442695, %v485_v33 }
  0xe5   :  { %v145_v36 = vpop.f32.mrf.mxu0  ;;  %v185_v37 = vpop.f32.mrf.mxu1 }
  0xe6   :  { %527 = vpow2.f32 %v392_v34  ;;  %v391_v38 = vmul.f32 -1.442695, %v145_v36  ;;  %v399_v39 = vmul.f32 -1.442695, %v185_v37 }
  0xe7   :  { %529 = vpow2.f32 %v400_v35  ;;  %v476_v40 = vpop.f32.mrf.mxu0  ;;  %v488_v41 = vpop.f32.mrf.mxu1 }
  0xe8   :  { %531 = vpow2.f32 %v391_v38  ;;  %v394_v42 = vmul.f32 -1.442695, %v476_v40  ;;  %v402_v43 = vmul.f32 -1.442695, %v488_v41 }
  0xe9   :  { %533 = vpow2.f32 %v399_v39  ;;  %v155_v44 = vpop.f32.mrf.mxu0  ;;  %v195_v45 = vpop.f32.mrf.mxu1 }
  0xea   :  { %535 = vpow2.f32 %v394_v42  ;;  %v393_v46 = vmul.f32 -1.442695, %v155_v44  ;;  %v401_v47 = vmul.f32 -1.442695, %v195_v45 }
  0xeb   :  { %537 = vpow2.f32 %v402_v43  ;;  %v479_v48 = vpop.f32.mrf.mxu0  ;;  %v491_v49 = vpop.f32.mrf.mxu1 }
  0xec   :  { %539 = vpow2.f32 %v393_v46  ;;  %v396_v50 = vmul.f32 -1.442695, %v479_v48  ;;  %v404_v51 = vmul.f32 -1.442695, %v491_v49 }
  0xed   :  { %541 = vpow2.f32 %v401_v47  ;;  %v165_v52 = vpop.f32.mrf.mxu0  ;;  %v205_v53 = vpop.f32.mrf.mxu1 }
  0xee   :  { %543 = vpow2.f32 %v396_v50  ;;  %v395_v54 = vmul.f32 -1.442695, %v165_v52  ;;  %v403_v55 = vmul.f32 -1.442695, %v205_v53 }
  0xef   :  { %545 = vpow2.f32 %v404_v51  ;;  %v482_v56 = vpop.f32.mrf.mxu0  ;;  %v494_v57 = vpop.f32.mrf.mxu1 }
  0xf0   :  { %547 = vpow2.f32 %v395_v54  ;;  %v398_v58 = vmul.f32 -1.442695, %v482_v56  ;;  %v406_v59 = vmul.f32 -1.442695, %v494_v57 }
  0xf1   :  { %549 = vpow2.f32 %v403_v55  ;;  %v175_v60 = vpop.f32.mrf.mxu0  ;;  %v215_v61 = vpop.f32.mrf.mxu1 }
  0xf2   :  { %551 = vpow2.f32 %v398_v58  ;;  %v397_v62 = vmul.f32 -1.442695, %v175_v60  ;;  %v405_v63 = vmul.f32 -1.442695, %v215_v61 }
  0xf3   :  { %v528_v0 = vpop.eup %527  ;;  %553 = vpow2.f32 %v406_v59 }
  0xf4   :  { %v530_v1 = vpop.eup %529  ;;  %v324_v2 = vadd.f32 1.0, %v528_v0  ;;  %555 = vpow2.f32 %v397_v62 }
  0xf5   :  { %v532_v3 = vpop.eup %531  ;;  %v332_v4 = vadd.f32 1.0, %v530_v1  ;;  %557 = vpow2.f32 %v405_v63 }
  0xf6   :  { %v534_v5 = vpop.eup %533  ;;  %559 = vrcp.f32 %v324_v2  ;;  %v323_v6 = vadd.f32 1.0, %v532_v3 }
  0xf7   :  { %v536_v7 = vpop.eup %535  ;;  %561 = vrcp.f32 %v332_v4  ;;  %v331_v8 = vadd.f32 1.0, %v534_v5 }
  0xf8   :  { %v538_v9 = vpop.eup %537  ;;  %563 = vrcp.f32 %v323_v6  ;;  %v326_v10 = vadd.f32 1.0, %v536_v7 }
  0xf9   :  { %v540_v11 = vpop.eup %539  ;;  %565 = vrcp.f32 %v331_v8  ;;  %v334_v12 = vadd.f32 1.0, %v538_v9 }
  0xfa   :  { %v542_v13 = vpop.eup %541  ;;  %567 = vrcp.f32 %v326_v10  ;;  %v325_v14 = vadd.f32 1.0, %v540_v11 }
  0xfb   :  { %v544_v15 = vpop.eup %543  ;;  %569 = vrcp.f32 %v334_v12  ;;  %v333_v16 = vadd.f32 1.0, %v542_v13 }
  0xfc   :  { %v546_v17 = vpop.eup %545  ;;  %571 = vrcp.f32 %v325_v14  ;;  %v328_v18 = vadd.f32 1.0, %v544_v15 }
  0xfd   :  { %v548_v19 = vpop.eup %547  ;;  %573 = vrcp.f32 %v333_v16  ;;  %v336_v20 = vadd.f32 1.0, %v546_v17 }
  0xfe   :  { %v550_v21 = vpop.eup %549  ;;  %575 = vrcp.f32 %v328_v18  ;;  %v327_v22 = vadd.f32 1.0, %v548_v19 }
  0xff   :  { %v552_v23 = vpop.eup %551  ;;  %577 = vrcp.f32 %v336_v20  ;;  %v335_v24 = vadd.f32 1.0, %v550_v21 }
 0x100   :  { %v554_v25 = vpop.eup %553  ;;  %579 = vrcp.f32 %v327_v22  ;;  %v330_v26 = vadd.f32 1.0, %v552_v23 }
 0x101   :  { %v556_v27 = vpop.eup %555  ;;  %581 = vrcp.f32 %v335_v24  ;;  %v338_v28 = vadd.f32 1.0, %v554_v25 }
 0x102   :  { %v558_v29 = vpop.eup %557  ;;  %583 = vrcp.f32 %v330_v26  ;;  %v329_v30 = vadd.f32 1.0, %v556_v27 }
 0x103   :  { %v560_v31 = vpop.eup %559  ;;  %585 = vrcp.f32 %v338_v28  ;;  %v337_v32 = vadd.f32 1.0, %v558_v29 }
 0x104   :  { %v562_v33 = vpop.eup %561  ;;  %372 = vst [vmem:[%s752_s2 + $0x8] sm:$0xff] %v560_v31  ;;  %587 = vrcp.f32 %v329_v30 }
 0x105   :  { %v564_v34 = vpop.eup %563  ;;  %380 = vst [vmem:[%s752_s2 + $0x48] sm:$0xff] %v562_v33  ;;  %589 = vrcp.f32 %v337_v32 }
 0x106   :  { %v566_v35 = vpop.eup %565  ;;  %371 = vst [vmem:[%s752_s2] sm:$0xff] %v564_v34 }
 0x107   :  { %v568_v36 = vpop.eup %567  ;;  %379 = vst [vmem:[%s752_s2 + $0x40] sm:$0xff] %v566_v35 }
 0x108   :  { %v570_v37 = vpop.eup %569  ;;  %374 = vst [vmem:[%s752_s2 + $0x18] sm:$0xff] %v568_v36 }
 0x109   :  { %v572_v38 = vpop.eup %571  ;;  %382 = vst [vmem:[%s752_s2 + $0x58] sm:$0xff] %v570_v37 }
 0x10a   :  { %v574_v39 = vpop.eup %573  ;;  %373 = vst [vmem:[%s752_s2 + $0x10] sm:$0xff] %v572_v38 }
 0x10b   :  { %v576_v40 = vpop.eup %575  ;;  %381 = vst [vmem:[%s752_s2 + $0x50] sm:$0xff] %v574_v39 }
 0x10c   :  { %v578_v41 = vpop.eup %577  ;;  %376 = vst [vmem:[%s752_s2 + $0x28] sm:$0xff] %v576_v40 }
 0x10d   :  { %v580_v42 = vpop.eup %579  ;;  %384 = vst [vmem:[%s752_s2 + $0x68] sm:$0xff] %v578_v41 }
 0x10e   :  { %v582_v43 = vpop.eup %581  ;;  %375 = vst [vmem:[%s752_s2 + $0x20] sm:$0xff] %v580_v42 }
 0x10f   :  { %v584_v44 = vpop.eup %583  ;;  %383 = vst [vmem:[%s752_s2 + $0x60] sm:$0xff] %v582_v43 }
 0x110   :  { %v586_v45 = vpop.eup %585  ;;  %378 = vst [vmem:[%s752_s2 + $0x38] sm:$0xff] %v584_v44 }
 0x111   :  { %v588_v46 = vpop.eup %587  ;;  %386 = vst [vmem:[%s752_s2 + $0x78] sm:$0xff] %v586_v45 }
 0x112   :  { %v590_v47 = vpop.eup %589  ;;  %377 = vst [vmem:[%s752_s2 + $0x30] sm:$0xff] %v588_v46 }
 0x113   :  { %385 = vst [vmem:[%s752_s2 + $0x70] sm:$0xff] %v590_v47 }

</bundles_post_ra>
